<compile_context>
chip_gen: v6e
topology: v6e:2x2x1
jax: 0.10.0
libtpu: 0.0.40
codegen_flags: <defaults>
</compile_context>

<pallas_src>
import functools

import jax
import jax.numpy as jnp
from jax import lax
from jax.experimental import pallas as pl
from jax.experimental.pallas import tpu as pltpu


# ----------------------------- Pallas LayerNorm ----------------------------- #

def _layernorm_kernel(x_ref, gamma_ref, beta_ref, o_ref, *, eps: float, inv_f: float):
    # x_ref: (TM, F) tile; gamma/beta: (1, F) (broadcast over rows).
    x = x_ref[...].astype(jnp.float32)
    gamma = gamma_ref[...].astype(jnp.float32)
    beta = beta_ref[...].astype(jnp.float32)

    # Row mean / biased variance (matches torch.nn.LayerNorm), via sums * 1/F.
    mean = jnp.sum(x, axis=-1, keepdims=True) * inv_f
    centered = x - mean
    var = jnp.sum(centered * centered, axis=-1, keepdims=True) * inv_f
    inv = lax.rsqrt(var + eps)

    o_ref[...] = (centered * inv * gamma + beta).astype(o_ref.dtype)


def _sublane_min(dtype) -> int:
    # Minimum second-minor tile size: 8 for 32-bit, 16 for bf16, 32 for 8-bit.
    itemsize = jnp.dtype(dtype).itemsize
    return max(8, 32 // max(1, itemsize))


def _round_up(n: int, m: int) -> int:
    return ((n + m - 1) // m) * m


def _pick_tile_rows(rows: int, features: int, dtype, max_tile_rows: int) -> int:
    """Largest dtype-aware row tile within a ~4 MiB/tile VMEM budget."""
    sub_min = _sublane_min(dtype)
    itemsize = jnp.dtype(dtype).itemsize
    bytes_per_row = features * itemsize
    # ~4 MiB per resident tile; with double-buffered in+out this is <=16 MiB,
    # comfortably under the 32 MiB scoped VMEM limit on v5e/v6e/v7x.
    budget_rows = max(sub_min, (4 * 1024 * 1024) // max(1, bytes_per_row))
    tile = min(budget_rows, max_tile_rows)
    # Never bigger than the (sublane-rounded) problem itself.
    tile = min(tile, _round_up(rows, sub_min))
    # Round down to a sublane multiple, but never below the minimum.
    tile = max(sub_min, (tile // sub_min) * sub_min)
    return tile


def layernorm_pallas(x, gamma, beta, *, eps: float = 1e-6, max_tile_rows: int = 4096):
    """LayerNorm over the last dim of x ([..., F]) via a Pallas TPU kernel."""
    orig_shape = x.shape
    F = orig_shape[-1]
    x2 = x.reshape(-1, F)
    rows = x2.shape[0]

    sub_min = _sublane_min(x2.dtype)
    tile_rows = _pick_tile_rows(rows, F, x2.dtype, max_tile_rows)

    # Only pad when rows is not a multiple of the dtype sublane minimum
    # (cheap, rare).  Partial last *tiles* are handled by the cdiv grid:
    # OOB reads stay confined to their own (discarded) rows, OOB stores are
    # masked by Pallas.
    padded_rows = _round_up(rows, sub_min)
    if padded_rows != rows:
        x2 = jnp.pad(x2, ((0, padded_rows - rows), (0, 0)))

    grid = pl.cdiv(padded_rows, tile_rows)

    gamma2 = gamma.reshape(1, F)
    beta2 = beta.reshape(1, F)

    out = pl.pallas_call(
        functools.partial(_layernorm_kernel, eps=eps, inv_f=1.0 / F),
        out_shape=jax.ShapeDtypeStruct((padded_rows, F), x.dtype),
        grid_spec=pltpu.PrefetchScalarGridSpec(
            num_scalar_prefetch=0,
            grid=(grid,),
            in_specs=[
                pl.BlockSpec((tile_rows, F), lambda i: (i, 0)),
                # Constant block index -> parameters DMA'd once, reused per step.
                pl.BlockSpec((1, F), lambda i: (0, 0)),
                pl.BlockSpec((1, F), lambda i: (0, 0)),
            ],
            out_specs=pl.BlockSpec((tile_rows, F), lambda i: (i, 0)),
        ),
        compiler_params=pltpu.CompilerParams(
            dimension_semantics=("parallel",),   # megacore-shardable on v7x
            vmem_limit_bytes=32 * 1024 * 1024,   # safe on 64 MiB (v7x) .. 128 MiB
        ),
    )(x2, gamma2, beta2)

    if padded_rows != rows:
        out = out[:rows]
    return out.reshape(orig_shape)


# ------------------------------- Decoder glue ------------------------------- #

def decoder_forward(x, encoder_output, src_mask, tgt_mask, layers, gamma, beta,
                    *, eps: float = 1e-6):
    """Mirrors Decoder.forward: apply each layer, then LayerNorm(features)."""
    # TODO(synk): the decoder layers are an opaque nn.ModuleList in the reference
    # module (no definition given); they are modeled here as JAX callables.
    for layer in layers:
        x = layer(x, encoder_output, src_mask, tgt_mask)
    return layernorm_pallas(x, gamma, beta, eps=eps)


# --------------------------- pure-JAX reference ------------------------------ #

def _layernorm_ref(x, gamma, beta, eps=1e-6):
    xf = x.astype(jnp.float32)
    mean = jnp.mean(xf, axis=-1, keepdims=True)
    var = jnp.mean((xf - mean) ** 2, axis=-1, keepdims=True)
    return (xf - mean) / jnp.sqrt(var + eps) * gamma.astype(jnp.float32) + beta.astype(jnp.float32)


# ----------------------------------- main ----------------------------------- #

if __name__ == "__main__":
    key = jax.random.PRNGKey(0)
    k_x, k_enc, k_g, k_b, k_x2, k_x3 = jax.random.split(key, 6)

    batch, seq, features = 2, 16, 128  # features_size = 128

    x = jax.random.normal(k_x, (batch, seq, features), dtype=jnp.float32)
    encoder_output = jax.random.normal(k_enc, (batch, seq, features), dtype=jnp.float32)
    src_mask = jnp.ones((batch, 1, 1, seq), dtype=jnp.float32)
    tgt_mask = jnp.tril(jnp.ones((seq, seq), dtype=jnp.float32))[None, None]

    # Deterministic LayerNorm affine parameters (perturbed from PyTorch's
    # default ones/zeros so the affine path is actually exercised).
    gamma = 1.0 + 0.1 * jax.random.normal(k_g, (features,), dtype=jnp.float32)
    beta = 0.1 * jax.random.normal(k_b, (features,), dtype=jnp.float32)

    layers = ()  # opaque in the reference module; empty -> Decoder == LayerNorm(x)

    # --- case 1: f32, small problem -> collapses to a single grid step -------
    out = decoder_forward(x, encoder_output, src_mask, tgt_mask, layers, gamma, beta)
    out = jax.block_until_ready(out)
    ref = _layernorm_ref(x, gamma, beta)
    assert out.shape == (batch, seq, features)
    assert jnp.max(jnp.abs(out.astype(jnp.float32) - ref)) < 1e-4

    # --- case 2: bf16 input, rows not a multiple of the sublane minimum ------
    xb = jax.random.normal(k_x2, (3, 37, features), dtype=jnp.float32).astype(jnp.bfloat16)
    outb = jax.block_until_ready(layernorm_pallas(xb, gamma, beta))
    refb = _layernorm_ref(xb, gamma, beta)
    assert outb.shape == xb.shape
    assert jnp.max(jnp.abs(outb.astype(jnp.float32) - refb)) < 1e-1  # bf16 quantization

    # --- case 3: f32, rows > tile -> multi-step grid with a partial last tile -
    xc = jax.random.normal(k_x3, (5, 33, features), dtype=jnp.float32)  # rows=165
    outc = jax.block_until_ready(layernorm_pallas(xc, gamma, beta, max_tile_rows=64))
    refc = _layernorm_ref(xc, gamma, beta)
    assert outc.shape == xc.shape
    assert jnp.max(jnp.abs(outc - refc)) < 1e-4

    print("KERNEL_OK")
</pallas_src>

<mosaic_0001>
module attributes {stable_mosaic.version = 11 : i64} {
  func.func @_layernorm_kernel(%arg0: i32, %arg1: memref<32x128xf32, #tpu.memory_space<vmem>>, %arg2: memref<1x128xf32, #tpu.memory_space<vmem>>, %arg3: memref<1x128xf32, #tpu.memory_space<vmem>>, %arg4: memref<32x128xf32, #tpu.memory_space<vmem>>) attributes {dimension_semantics = [#tpu.dimension_semantics<parallel>], iteration_bounds = array<i64: 1>, scalar_prefetch = 0 : i64, scratch_operands = 0 : i64, tpu.core_type = #tpu.core_type<tc>, window_params = [{transform_indices = @transform_0, window_bounds = array<i64: 32, 128>}, {pipeline_mode = #tpu.pipeline_mode<synchronous>, transform_indices = @transform_1, window_bounds = array<i64: 1, 128>}, {pipeline_mode = #tpu.pipeline_mode<synchronous>, transform_indices = @transform_2, window_bounds = array<i64: 1, 128>}, {transform_indices = @transform_3, window_bounds = array<i64: 32, 128>}]} {
    %c0 = arith.constant 0 : index
    %c0_0 = arith.constant 0 : index
    %0 = vector.load %arg1[%c0, %c0_0] : memref<32x128xf32, #tpu.memory_space<vmem>>, vector<32x128xf32>
    %c0_1 = arith.constant 0 : index
    %c0_2 = arith.constant 0 : index
    %1 = vector.load %arg2[%c0_1, %c0_2] : memref<1x128xf32, #tpu.memory_space<vmem>>, vector<1x128xf32>
    %c0_3 = arith.constant 0 : index
    %c0_4 = arith.constant 0 : index
    %2 = vector.load %arg3[%c0_3, %c0_4] : memref<1x128xf32, #tpu.memory_space<vmem>>, vector<1x128xf32>
    %cst = arith.constant dense<0.000000e+00> : vector<32xf32>
    %3 = vector.multi_reduction <add>, %0, %cst [1] : vector<32x128xf32> to vector<32xf32>
    %4 = vector.shape_cast %3 : vector<32xf32> to vector<32x1xf32>
    %cst_5 = arith.constant 7.812500e-03 : f32
    %5 = vector.broadcast %cst_5 : f32 to vector<32x1xf32>
    %6 = arith.mulf %4, %5 : vector<32x1xf32>
    %7 = vector.broadcast %6 : vector<32x1xf32> to vector<32x128xf32>
    %8 = arith.subf %0, %7 : vector<32x128xf32>
    %9 = arith.mulf %8, %8 : vector<32x128xf32>
    %cst_6 = arith.constant dense<0.000000e+00> : vector<32xf32>
    %10 = vector.multi_reduction <add>, %9, %cst_6 [1] : vector<32x128xf32> to vector<32xf32>
    %11 = vector.shape_cast %10 : vector<32xf32> to vector<32x1xf32>
    %cst_7 = arith.constant 7.812500e-03 : f32
    %12 = vector.broadcast %cst_7 : f32 to vector<32x1xf32>
    %13 = arith.mulf %11, %12 : vector<32x1xf32>
    %cst_8 = arith.constant 9.99999997E-7 : f32
    %14 = vector.broadcast %cst_8 : f32 to vector<32x1xf32>
    %15 = arith.addf %13, %14 : vector<32x1xf32>
    %16 = math.rsqrt %15 : vector<32x1xf32>
    %17 = vector.broadcast %16 : vector<32x1xf32> to vector<32x128xf32>
    %18 = arith.mulf %8, %17 : vector<32x128xf32>
    %19 = vector.broadcast %1 : vector<1x128xf32> to vector<32x128xf32>
    %20 = arith.mulf %18, %19 : vector<32x128xf32>
    %21 = vector.broadcast %2 : vector<1x128xf32> to vector<32x128xf32>
    %22 = arith.addf %20, %21 : vector<32x128xf32>
    %c0_9 = arith.constant 0 : index
    %c0_10 = arith.constant 0 : index
    %23 = vector.load %arg4[%c0_9, %c0_10] : memref<32x128xf32, #tpu.memory_space<vmem>>, vector<32x128xf32>
    tpu.vector_store %arg4[%c0_9, %c0_10], %22 {strides = array<i32>} : memref<32x128xf32, #tpu.memory_space<vmem>>, vector<32x128xf32>,
    return
  }
  func.func @transform_0(%arg0: i32) -> (i32, i32) {
    %c0_i32 = arith.constant 0 : i32
    %c0_i32_0 = arith.constant 0 : i32
    return %arg0, %c0_i32 : i32, i32
  }
  func.func @transform_1(%arg0: i32) -> (i32, i32) {
    %c0_i32 = arith.constant 0 : i32
    %c0_i32_0 = arith.constant 0 : i32
    %c0_i32_1 = arith.constant 0 : i32
    return %c0_i32, %c0_i32_0 : i32, i32
  }
  func.func @transform_2(%arg0: i32) -> (i32, i32) {
    %c0_i32 = arith.constant 0 : i32
    %c0_i32_0 = arith.constant 0 : i32
    %c0_i32_1 = arith.constant 0 : i32
    return %c0_i32, %c0_i32_0 : i32, i32
  }
  func.func @transform_3(%arg0: i32) -> (i32, i32) {
    %c0_i32 = arith.constant 0 : i32
    %c0_i32_0 = arith.constant 0 : i32
    return %arg0, %c0_i32 : i32, i32
  }
}

</mosaic_0001>

<bundles_post_ra>
// kernel: tpu_custom_call.1
= control target key start
LH: loop header
LB: loop body
LE: loop exit
PB: predicated region body
PF: predicated region fallthrough
CT: control target
= control target key end

     0   :  { %8 = vsyncpa [#allocation3], 0  ;;  %s220_s0 = inlined_call_operand.hbm [shape: f32[32,128], index: 0, kind: input, shape index: {}]   ;;  %s221_s1 = inlined_call_operand.vmem [shape: f32[1,128], index: 1, kind: input, shape index: {}]   ;;  %s222_s2 = inlined_call_operand.vmem [shape: f32[1,128], index: 2, kind: input, shape index: {}]   ;;  %s223_s3 = inlined_call_operand.hbm [shape: f32[32,128], index: 3, kind: output, shape index: {}]  }
   0x1   :  { %9 = vsyncpa [#allocation4], 0  ;;  %s178_s12 = smov [#allocation2]  }
   0x2   :  { %s15_s13 = sshll.u32 %s178_s12, 4  ;;  %s16_s13 = int_to_ptr.vmem [resolvable:$true] %s15_s13 }
   0x3   :  { %s142_s14 = scalar_lea.vmem %s16_s13, 512  ;;  %p147_p1 = scmp.lt.s32.totalorder %s16_s13, %s16_s13 }
   0x4   :  { %p143_p0 = scmp.ne.s32.totalorder %s16_s13, %s142_s14  ;;  %p148_p2 = scmp.lt.s32.totalorder %s142_s14, %s142_s14 }
   0x6   :  { %p149_p3 = por %p148_p2, %p147_p1 }
   0x8   :  { %p150_p4 = pnand %p149_p3, %p143_p0 }
   0xa   :  { %153 = shalt.err (!%p150_p4)
}
   0xb   :  { %s179_s15 = smov 128   ;;  %s180_s16 = smov 8  }
   0xc   :  { %21 = dma.hbm_to_vmem [thread:$0]  %s220_s0, 512, %s16_s13, [#allocation3], %s179_s15, %s179_s15, %s180_s16  }
   0xd   :  { %174 = dma.done.wait [#allocation3], 512  }
   0xe   :  { %175 = vsyncadd [#allocation3], 4294966784  ;;  %v29_v0 = vld [vmem:[#allocation2] sm:$0xff]  ;;  %v31_v1 = vld [vmem:[#allocation2 + $0x10] sm:$0xff]  ;;  %s181_s22 = smov [#allocation5]  }
   0xf   :  { %35 = vadd.xlane.f32.xlu0 %v29_v0  ;;  %39 = vadd.xlane.f32.xlu1 %v31_v1  ;;  %v30_v2 = vld [vmem:[#allocation2 + $0x8] sm:$0xff]  ;;  %v32_v3 = vld [vmem:[#allocation2 + $0x18] sm:$0xff]  ;;  %v120_v33 = vld [vmem:[%s221_s1] ss:$0 sm:$0xff]  ;;  %s108_s1 = sshll.u32 %s181_s22, 4  ;;  %s109_s1 = int_to_ptr.vmem [resolvable:$true] %s108_s1 }
  0x10   :  { %v121_v35 = vld [vmem:[%s222_s2] ss:$0 sm:$0xff]  ;;  %s154_s2 = scalar_lea.vmem %s109_s1, 512  ;;  %p159_p6 = scmp.lt.s32.totalorder %s109_s1, %s109_s1 }
  0x11   :  { %p155_p5 = scmp.ne.s32.totalorder %s109_s1, %s154_s2  ;;  %p160_p7 = scmp.lt.s32.totalorder %s154_s2, %s154_s2 }
  0x13   :  { %37 = vadd.xlane.f32.xlu0 %v30_v2  ;;  %41 = vadd.xlane.f32.xlu1 %v32_v3  ;;  %p161_p8 = por %p160_p7, %p159_p6 }
  0x15   :  { %p162_p9 = pnand %p161_p8, %p155_p5 }
  0x98   :  { %v36_v4 = vpop.xlane.xlu0 %35  ;;  %v40_v5 = vpop.xlane.xlu1 %39 }
  0x99   :  { %v43_v6 = vmul.f32 0.0078125, %v36_v4  ;;  %v45_v7 = vmul.f32 0.0078125, %v40_v5 }
  0x9b   :  { %v47_v8 = vsub.f32 %v29_v0, %v43_v6  ;;  %v49_v9 = vsub.f32 %v31_v1, %v45_v7 }
  0x9c   :  { %v38_v10 = vpop.xlane.xlu0 %37  ;;  %v42_v11 = vpop.xlane.xlu1 %41 }
  0x9d   :  { %v44_v12 = vmul.f32 0.0078125, %v38_v10  ;;  %v51_v13 = vmul.f32 %v47_v8, %v47_v8  ;;  %v46_v14 = vmul.f32 0.0078125, %v42_v11  ;;  %v53_v17 = vmul.f32 %v49_v9, %v49_v9 }
  0x9f   :  { %v48_v15 = vsub.f32 %v30_v2, %v44_v12  ;;  %55 = vadd.xlane.f32.xlu0 %v51_v13  ;;  %v50_v16 = vsub.f32 %v32_v3, %v46_v14 }
  0xa1   :  { %v52_v18 = vmul.f32 %v48_v15, %v48_v15  ;;  %v54_v19 = vmul.f32 %v50_v16, %v50_v16 }
  0xa3   :  { %59 = vadd.xlane.f32.xlu0 %v53_v17  ;;  %57 = vadd.xlane.f32.xlu1 %v52_v18 }
  0xa7   :  { %61 = vadd.xlane.f32.xlu1 %v54_v19 }
 0x128   :  { %v56_v20 = vpop.xlane.xlu0 %55 }
 0x129   :  { %v63_v21 = vmul.f32 0.0078125, %v56_v20 }
 0x12b   :  { %v67_v22 = vadd.f32 1e-06, %v63_v21 }
 0x12c   :  { %v58_v23 = vpop.xlane.xlu1 %57  ;;  %v60_v24 = vpop.xlane.xlu0 %59 }
 0x12d   :  { %126 = vrsqrt.f32 %v67_v22  ;;  %v64_v25 = vmul.f32 0.0078125, %v58_v23  ;;  %v65_v26 = vmul.f32 0.0078125, %v60_v24 }
 0x12f   :  { %v68_v27 = vadd.f32 1e-06, %v64_v25  ;;  %v69_v28 = vadd.f32 1e-06, %v65_v26 }
 0x130   :  { %v62_v29 = vpop.xlane.xlu1 %61 }
 0x131   :  { %128 = vrsqrt.f32 %v68_v27  ;;  %v66_v30 = vmul.f32 0.0078125, %v62_v29 }
 0x132   :  { %130 = vrsqrt.f32 %v69_v28 }
 0x133   :  { %v70_v31 = vadd.f32 1e-06, %v66_v30 }
 0x135   :  { %132 = vrsqrt.f32 %v70_v31 }
 0x13a   :  { %v127_v32 = vpop.eup %126 }
 0x13b   :  { %v75_v34 = vmul.f32 %v127_v32, %v47_v8 }
 0x13d   :  { %v85_v36 = vmul.f32 %v120_v33, %v75_v34 }
 0x13e   :  { %v129_v37 = vpop.eup %128 }
 0x13f   :  { %v131_v38 = vpop.eup %130  ;;  %v76_v39 = vmul.f32 %v129_v37, %v48_v15  ;;  %v95_v40 = vadd.f32 %v121_v35, %v85_v36 }
 0x140   :  { %v77_v41 = vmul.f32 %v131_v38, %v49_v9 }
 0x141   :  { %v86_v42 = vmul.f32 %v120_v33, %v76_v39  ;;  %99 = vst [vmem:[#allocation5] sm:$0xff] %v95_v40 }
 0x142   :  { %v133_v43 = vpop.eup %132  ;;  %v87_v44 = vmul.f32 %v120_v33, %v77_v41 }
 0x143   :  { %v78_v45 = vmul.f32 %v133_v43, %v50_v16  ;;  %v96_v46 = vadd.f32 %v121_v35, %v86_v42 }
 0x144   :  { %v97_v47 = vadd.f32 %v121_v35, %v87_v44 }
 0x145   :  { %v88_v48 = vmul.f32 %v120_v33, %v78_v45  ;;  %100 = vst [vmem:[#allocation5 + $0x8] sm:$0xff] %v96_v46 }
 0x146   :  { %101 = vst [vmem:[#allocation5 + $0x10] sm:$0xff] %v97_v47 }
 0x147   :  { %v98_v49 = vadd.f32 %v121_v35, %v88_v48 }
 0x149   :  { %102 = vst [vmem:[#allocation5 + $0x18] sm:$0xff] %v98_v49 }
 0x14a   :  { %165 = shalt.err (!%p162_p9)
}
 0x14b   :  { %114 = dma.vmem_to_hbm [thread:$0]  %s109_s1, 512, %s223_s3, [#allocation4], %s179_s15, %s179_s15, %s180_s16  }
 0x14c   :  { %176 = dma.done.wait [#allocation4], 512  }
 0x14d   :  { %177 = vsyncadd [#allocation4], 4294966784 }
 0x14e   :  { %118 = vsyncpa [#allocation3], 1 }
 0x14f   :  { %119 = vsyncpa [#allocation4], 1 }

</bundles_post_ra>
